<compile_context>
chip_gen: v6e
topology: v6e:2x2x1
jax: 0.10.0
libtpu: 0.0.40
codegen_flags: <defaults>
</compile_context>

<pallas_src>
import jax
import jax.numpy as jnp
from jax.experimental import pallas as pl
from jax.experimental.pallas import tpu as pltpu

H_DIM = 30
MAX_BB = 4096            # cap on batch rows per grid step


def _round_up(x, m):
    return ((x + m - 1) // m) * m


def _batch_tile(B):
    """Batch rows per grid step.

    Guarantees an even number of >= 2 grid steps (so both v7x TensorCores get
    work through the 'parallel' axis) while making each step as large as
    possible (<= MAX_BB) to amortize fixed per-step overhead on v5e/v6e.
    """
    n_steps = max(2, 2 * pl.cdiv(B, 2 * MAX_BB))
    bb = _round_up(pl.cdiv(B, n_steps), 128)
    bb = min(bb, _round_up(B, 8))     # never (much) larger than the array
    return max(bb, 8)


def generator_kernel(z_ref,
                     w1_ref, b1_ref,
                     w2_ref, b2_ref,
                     w3_ref, b3_ref,
                     w4_ref, b4_ref,
                     o_ref):
    z = z_ref[...]                                              # (bb, 2)

    # Layer 1: in_features == 2, so a K=2 matmul would waste the MXU.  Do it
    # on the VPU as two rank-1 updates (lane-broadcast z column times a
    # sublane-broadcast weight row) + bias.
    h = (z[:, 0:1] * w1_ref[0:1, :]
         + z[:, 1:2] * w1_ref[1:2, :]
         + b1_ref[...])                                         # (bb, 30)
    h = jnp.maximum(h, 0.0)

    # Layers 2/3: 30x30 contractions on the MXU with f32 accumulation.
    h = jnp.dot(h, w2_ref[...], preferred_element_type=jnp.float32) + b2_ref[...]
    h = jnp.maximum(h, 0.0)
    h = jnp.dot(h, w3_ref[...], preferred_element_type=jnp.float32) + b3_ref[...]
    h = jnp.maximum(h, 0.0)

    # Layer 4 + Tanh (EUP).
    h = jnp.dot(h, w4_ref[...], preferred_element_type=jnp.float32) + b4_ref[...]
    o_ref[...] = jnp.tanh(h)                                    # (bb, 2)


def pack_params(params):
    """PyTorch-layout params [(W (out,in), b (out,))] -> kernel layout.

    One-time packing of tiny arrays: W -> W.T (in,out), b -> (1,out), so the
    kernel computes h @ W_t + b with no per-step weight transposes.
    """
    return [(jnp.asarray(w).T, jnp.asarray(b).reshape(1, -1)) for w, b in params]


def generator_forward(z, packed_params):
    """z: (B, 2) float32 -> (B, 2) float32 (PyTorch Generator.forward)."""
    B, in_dim = z.shape
    assert in_dim == 2
    (w1, b1), (w2, b2), (w3, b3), (w4, b4) = packed_params

    bb = _batch_tile(B)
    grid = (pl.cdiv(B, bb),)

    def const_spec(a):
        # Whole (tiny) parameter array, resident every grid step.
        return pl.BlockSpec(a.shape, lambda i: (0, 0))

    n_param_elems = sum(int(w.size) + int(b.size) for (w, b) in packed_params)
    cost = pl.CostEstimate(
        flops=2 * B * (2 * H_DIM + H_DIM * H_DIM + H_DIM * H_DIM + H_DIM * 2),
        transcendentals=2 * B,                       # tanh on 2 outputs/row
        bytes_accessed=4 * B * (2 + 2) + 4 * n_param_elems,
    )

    return pl.pallas_call(
        generator_kernel,
        out_shape=jax.ShapeDtypeStruct((B, 2), jnp.float32),
        grid_spec=pltpu.PrefetchScalarGridSpec(
            num_scalar_prefetch=0,
            grid=grid,
            in_specs=[
                pl.BlockSpec((bb, 2), lambda i: (i, 0)),   # contiguous z tile
                const_spec(w1), const_spec(b1),
                const_spec(w2), const_spec(b2),
                const_spec(w3), const_spec(b3),
                const_spec(w4), const_spec(b4),
            ],
            out_specs=pl.BlockSpec((bb, 2), lambda i: (i, 0)),
        ),
        compiler_params=pltpu.CompilerParams(
            dimension_semantics=("parallel",),
            vmem_limit_bytes=32 * 1024 * 1024,
        ),
        cost_estimate=cost,
    )(z, w1, b1, w2, b2, w3, b3, w4, b4)


def init_params(key):
    """PyTorch nn.Linear default init; W stored as (out, in), b as (out,)."""
    dims = [(2, H_DIM), (H_DIM, H_DIM), (H_DIM, H_DIM), (H_DIM, 2)]
    params = []
    for fan_in, fan_out in dims:
        key, kw, kb = jax.random.split(key, 3)
        bound = float(fan_in) ** -0.5   # U(-1/sqrt(fan_in), 1/sqrt(fan_in))
        w = jax.random.uniform(kw, (fan_out, fan_in), jnp.float32, -bound, bound)
        b = jax.random.uniform(kb, (fan_out,), jnp.float32, -bound, bound)
        params.append((w, b))
    return params


def reference_forward(z, params):
    """Pure-JAX equivalent of the PyTorch module (full-precision matmuls)."""
    h = z
    for i, (w, b) in enumerate(params):
        h = jnp.dot(h, w.T, precision=jax.lax.Precision.HIGHEST) + b
        if i < 3:
            h = jnp.maximum(h, 0.0)
        else:
            h = jnp.tanh(h)
    return h


if __name__ == "__main__":
    key = jax.random.PRNGKey(0)
    kz, kp = jax.random.split(key)

    B = 256                               # small batch, multiple of 128
    z = jax.random.normal(kz, (B, 2), jnp.float32)
    params = init_params(kp)
    packed = pack_params(params)

    out = generator_forward(z, packed)
    out = jax.block_until_ready(out)

    ref = reference_forward(z, params)
    assert out.shape == (B, 2)
    # Kernel MXU f32 passes vs. HIGHEST-precision reference: allow 1e-4.
    assert jnp.allclose(out, ref, atol=1e-4, rtol=1e-4), "mismatch vs JAX reference"

    print("KERNEL_OK")
</pallas_src>

<mosaic_0001>
module attributes {stable_mosaic.version = 11 : i64} {
  func.func @generator_kernel(%arg0: i32, %arg1: memref<128x2xf32, #tpu.memory_space<vmem>>, %arg2: memref<2x30xf32, #tpu.memory_space<vmem>>, %arg3: memref<1x30xf32, #tpu.memory_space<vmem>>, %arg4: memref<30x30xf32, #tpu.memory_space<vmem>>, %arg5: memref<1x30xf32, #tpu.memory_space<vmem>>, %arg6: memref<30x30xf32, #tpu.memory_space<vmem>>, %arg7: memref<1x30xf32, #tpu.memory_space<vmem>>, %arg8: memref<30x2xf32, #tpu.memory_space<vmem>>, %arg9: memref<1x2xf32, #tpu.memory_space<vmem>>, %arg10: memref<128x2xf32, #tpu.memory_space<vmem>>) attributes {dimension_semantics = [#tpu.dimension_semantics<parallel>], iteration_bounds = array<i64: 2>, scalar_prefetch = 0 : i64, scratch_operands = 0 : i64, tpu.core_type = #tpu.core_type<tc>, window_params = [{transform_indices = @transform_0, window_bounds = array<i64: 128, 2>}, {pipeline_mode = #tpu.pipeline_mode<synchronous>, transform_indices = @transform_1, window_bounds = array<i64: 2, 30>}, {pipeline_mode = #tpu.pipeline_mode<synchronous>, transform_indices = @transform_2, window_bounds = array<i64: 1, 30>}, {pipeline_mode = #tpu.pipeline_mode<synchronous>, transform_indices = @transform_3, window_bounds = array<i64: 30, 30>}, {pipeline_mode = #tpu.pipeline_mode<synchronous>, transform_indices = @transform_4, window_bounds = array<i64: 1, 30>}, {pipeline_mode = #tpu.pipeline_mode<synchronous>, transform_indices = @transform_5, window_bounds = array<i64: 30, 30>}, {pipeline_mode = #tpu.pipeline_mode<synchronous>, transform_indices = @transform_6, window_bounds = array<i64: 1, 30>}, {pipeline_mode = #tpu.pipeline_mode<synchronous>, transform_indices = @transform_7, window_bounds = array<i64: 30, 2>}, {pipeline_mode = #tpu.pipeline_mode<synchronous>, transform_indices = @transform_8, window_bounds = array<i64: 1, 2>}, {transform_indices = @transform_9, window_bounds = array<i64: 128, 2>}]} {
    %c0 = arith.constant 0 : index
    %c0_0 = arith.constant 0 : index
    %0 = vector.load %arg1[%c0, %c0_0] : memref<128x2xf32, #tpu.memory_space<vmem>>, vector<128x2xf32>
    %1 = vector.extract_strided_slice %0 {offsets = [0, 0], sizes = [128, 1], strides = [1, 1]} : vector<128x2xf32> to vector<128x1xf32>
    %c0_1 = arith.constant 0 : index
    %c0_2 = arith.constant 0 : index
    %2 = vector.load %arg2[%c0_1, %c0_2] : memref<2x30xf32, #tpu.memory_space<vmem>>, vector<1x30xf32>
    %3 = vector.broadcast %1 : vector<128x1xf32> to vector<128x30xf32>
    %4 = vector.broadcast %2 : vector<1x30xf32> to vector<128x30xf32>
    %5 = arith.mulf %3, %4 : vector<128x30xf32>
    %6 = vector.extract_strided_slice %0 {offsets = [0, 1], sizes = [128, 1], strides = [1, 1]} : vector<128x2xf32> to vector<128x1xf32>
    %c1 = arith.constant 1 : index
    %c0_3 = arith.constant 0 : index
    %7 = vector.load %arg2[%c1, %c0_3] : memref<2x30xf32, #tpu.memory_space<vmem>>, vector<1x30xf32>
    %8 = vector.broadcast %6 : vector<128x1xf32> to vector<128x30xf32>
    %9 = vector.broadcast %7 : vector<1x30xf32> to vector<128x30xf32>
    %10 = arith.mulf %8, %9 : vector<128x30xf32>
    %11 = arith.addf %5, %10 : vector<128x30xf32>
    %c0_4 = arith.constant 0 : index
    %c0_5 = arith.constant 0 : index
    %12 = vector.load %arg3[%c0_4, %c0_5] : memref<1x30xf32, #tpu.memory_space<vmem>>, vector<1x30xf32>
    %13 = vector.broadcast %12 : vector<1x30xf32> to vector<128x30xf32>
    %14 = arith.addf %11, %13 : vector<128x30xf32>
    %cst = arith.constant 0.000000e+00 : f32
    %15 = vector.broadcast %cst : f32 to vector<128x30xf32>
    %16 = arith.maximumf %14, %15 : vector<128x30xf32>
    %c0_6 = arith.constant 0 : index
    %c0_7 = arith.constant 0 : index
    %17 = vector.load %arg4[%c0_6, %c0_7] : memref<30x30xf32, #tpu.memory_space<vmem>>, vector<30x30xf32>
    %cst_8 = arith.constant dense<0.000000e+00> : vector<128x30xf32>
    %18 = tpu.matmul %16, %17, %cst_8 {dimension_numbers = #tpu.dot_dimension_numbers<[1], [0], [0], [1], [0, 0, 1, 1], [], []>} : vector<128x30xf32>, vector<30x30xf32>, vector<128x30xf32> -> vector<128x30xf32>
    %c0_9 = arith.constant 0 : index
    %c0_10 = arith.constant 0 : index
    %19 = vector.load %arg5[%c0_9, %c0_10] : memref<1x30xf32, #tpu.memory_space<vmem>>, vector<1x30xf32>
    %20 = vector.broadcast %19 : vector<1x30xf32> to vector<128x30xf32>
    %21 = arith.addf %18, %20 : vector<128x30xf32>
    %cst_11 = arith.constant 0.000000e+00 : f32
    %22 = vector.broadcast %cst_11 : f32 to vector<128x30xf32>
    %23 = arith.maximumf %21, %22 : vector<128x30xf32>
    %c0_12 = arith.constant 0 : index
    %c0_13 = arith.constant 0 : index
    %24 = vector.load %arg6[%c0_12, %c0_13] : memref<30x30xf32, #tpu.memory_space<vmem>>, vector<30x30xf32>
    %cst_14 = arith.constant dense<0.000000e+00> : vector<128x30xf32>
    %25 = tpu.matmul %23, %24, %cst_14 {dimension_numbers = #tpu.dot_dimension_numbers<[1], [0], [0], [1], [0, 0, 1, 1], [], []>} : vector<128x30xf32>, vector<30x30xf32>, vector<128x30xf32> -> vector<128x30xf32>
    %c0_15 = arith.constant 0 : index
    %c0_16 = arith.constant 0 : index
    %26 = vector.load %arg7[%c0_15, %c0_16] : memref<1x30xf32, #tpu.memory_space<vmem>>, vector<1x30xf32>
    %27 = vector.broadcast %26 : vector<1x30xf32> to vector<128x30xf32>
    %28 = arith.addf %25, %27 : vector<128x30xf32>
    %cst_17 = arith.constant 0.000000e+00 : f32
    %29 = vector.broadcast %cst_17 : f32 to vector<128x30xf32>
    %30 = arith.maximumf %28, %29 : vector<128x30xf32>
    %c0_18 = arith.constant 0 : index
    %c0_19 = arith.constant 0 : index
    %31 = vector.load %arg8[%c0_18, %c0_19] : memref<30x2xf32, #tpu.memory_space<vmem>>, vector<30x2xf32>
    %cst_20 = arith.constant dense<0.000000e+00> : vector<128x2xf32>
    %32 = tpu.matmul %30, %31, %cst_20 {dimension_numbers = #tpu.dot_dimension_numbers<[1], [0], [0], [1], [0, 0, 1, 1], [], []>} : vector<128x30xf32>, vector<30x2xf32>, vector<128x2xf32> -> vector<128x2xf32>
    %c0_21 = arith.constant 0 : index
    %c0_22 = arith.constant 0 : index
    %33 = vector.load %arg9[%c0_21, %c0_22] : memref<1x2xf32, #tpu.memory_space<vmem>>, vector<1x2xf32>
    %34 = vector.broadcast %33 : vector<1x2xf32> to vector<128x2xf32>
    %35 = arith.addf %32, %34 : vector<128x2xf32>
    %36 = math.tanh %35 : vector<128x2xf32>
    %c0_23 = arith.constant 0 : index
    %c0_24 = arith.constant 0 : index
    %37 = vector.load %arg10[%c0_23, %c0_24] : memref<128x2xf32, #tpu.memory_space<vmem>>, vector<128x2xf32>
    tpu.vector_store %arg10[%c0_23, %c0_24], %36 {strides = array<i32>} : memref<128x2xf32, #tpu.memory_space<vmem>>, vector<128x2xf32>,
    return
  }
  func.func @transform_0(%arg0: i32) -> (i32, i32) {
    %c0_i32 = arith.constant 0 : i32
    %c0_i32_0 = arith.constant 0 : i32
    return %arg0, %c0_i32 : i32, i32
  }
  func.func @transform_1(%arg0: i32) -> (i32, i32) {
    %c0_i32 = arith.constant 0 : i32
    %c0_i32_0 = arith.constant 0 : i32
    %c0_i32_1 = arith.constant 0 : i32
    return %c0_i32, %c0_i32_0 : i32, i32
  }
  func.func @transform_2(%arg0: i32) -> (i32, i32) {
    %c0_i32 = arith.constant 0 : i32
    %c0_i32_0 = arith.constant 0 : i32
    %c0_i32_1 = arith.constant 0 : i32
    return %c0_i32, %c0_i32_0 : i32, i32
  }
  func.func @transform_3(%arg0: i32) -> (i32, i32) {
    %c0_i32 = arith.constant 0 : i32
    %c0_i32_0 = arith.constant 0 : i32
    %c0_i32_1 = arith.constant 0 : i32
    return %c0_i32, %c0_i32_0 : i32, i32
  }
  func.func @transform_4(%arg0: i32) -> (i32, i32) {
    %c0_i32 = arith.constant 0 : i32
    %c0_i32_0 = arith.constant 0 : i32
    %c0_i32_1 = arith.constant 0 : i32
    return %c0_i32, %c0_i32_0 : i32, i32
  }
  func.func @transform_5(%arg0: i32) -> (i32, i32) {
    %c0_i32 = arith.constant 0 : i32
    %c0_i32_0 = arith.constant 0 : i32
    %c0_i32_1 = arith.constant 0 : i32
    return %c0_i32, %c0_i32_0 : i32, i32
  }
  func.func @transform_6(%arg0: i32) -> (i32, i32) {
    %c0_i32 = arith.constant 0 : i32
    %c0_i32_0 = arith.constant 0 : i32
    %c0_i32_1 = arith.constant 0 : i32
    return %c0_i32, %c0_i32_0 : i32, i32
  }
  func.func @transform_7(%arg0: i32) -> (i32, i32) {
    %c0_i32 = arith.constant 0 : i32
    %c0_i32_0 = arith.constant 0 : i32
    %c0_i32_1 = arith.constant 0 : i32
    return %c0_i32, %c0_i32_0 : i32, i32
  }
  func.func @transform_8(%arg0: i32) -> (i32, i32) {
    %c0_i32 = arith.constant 0 : i32
    %c0_i32_0 = arith.constant 0 : i32
    %c0_i32_1 = arith.constant 0 : i32
    return %c0_i32, %c0_i32_0 : i32, i32
  }
  func.func @transform_9(%arg0: i32) -> (i32, i32) {
    %c0_i32 = arith.constant 0 : i32
    %c0_i32_0 = arith.constant 0 : i32
    return %arg0, %c0_i32 : i32, i32
  }
}

</mosaic_0001>

<bundles_post_ra>
// kernel: tpu_custom_call.1
= control target key start
LH: loop header
LB: loop body
LE: loop exit
PB: predicated region body
PF: predicated region fallthrough
CT: control target
= control target key end

     0   :  { %s1676_s30 = smov 0   ;;  %s1934_s0 = inlined_call_operand.vmem [shape: f32[256,2], index: 0, kind: input, shape index: {}]   ;;  %s1935_s1 = inlined_call_operand.vmem [shape: f32[2,30], index: 1, kind: input, shape index: {}]   ;;  %s1936_s2 = inlined_call_operand.vmem [shape: f32[1,30], index: 2, kind: input, shape index: {}]   ;;  %s1937_s3 = inlined_call_operand.vmem [shape: f32[30,30], index: 3, kind: input, shape index: {}]   ;;  %s1938_s4 = inlined_call_operand.vmem [shape: f32[1,30], index: 4, kind: input, shape index: {}]   ;;  %s1939_s5 = inlined_call_operand.vmem [shape: f32[30,30], index: 5, kind: input, shape index: {}]   ;;  %s1940_s6 = inlined_call_operand.vmem [shape: f32[1,30], index: 6, kind: input, shape index: {}]   ;;  %s1941_s7 = inlined_call_operand.vmem [shape: f32[30,2], index: 7, kind: input, shape index: {}]   ;;  %s1942_s8 = inlined_call_operand.vmem [shape: f32[1,2], index: 8, kind: input, shape index: {}]   ;;  %s1943_s9 = inlined_call_operand.vmem [shape: f32[256,2], index: 9, kind: output, shape index: {}]  }
   0x1 LB: > { %s1337_s10 = sadd.s32 4294967295, %s1622_s30   ;;  %p1341_p0 = scmp.ge.s32.totalorder %s1622_s30, 1  ;;  %s1622_s30 = sphi %s1676_s30, %s19_s30  }
   0x2   : > { %p288_p1 = scmp.lt.s32.totalorder %s1622_s30, 3 }
   0x4   : > { %p289_p2 = pnand %p1341_p0, %p288_p1 }
   0x5   : > { %s1342_s11 = sshll.u32 (!%p289_p2), %s1337_s10, 4 }
   0x6   : > { %292 = sbr.rel (%p289_p2) target bundleno = 821 (0x335), region = 56  ;;  %p325_p3 = scmp.lt.s32.totalorder (!%p289_p2), %s1342_s11, 31 }
   0xb   : > { %v1624_v0 = vmov 0   ;;  %s1945_s11 = smov (!%p325_p3, %s1342_s11), 31  ;;  %vm653_vm0 = vcmask 1045504   ;;  %v1625_v3 = vmov 1   ;;  %v596_v4 = vld [vmem:[%s1937_s3 + $0x18] sm:$0x3f] }
   0xc   : > { %1581 = vset.pattern.permute.xlu1 %v1624_v0  ;;  %1579 = vset.pattern.permute.xlu0 %v1624_v0  ;;  %s1343_s12 = sshll.u32 %s1945_s11, 3  ;;  %v595_v5 = vld [vmem:[%s1937_s3 + $0x10] sm:$0xff]  ;;  %v594_v7 = vld [vmem:[%s1937_s3 + $0x8] sm:$0xff]  ;;  %v593_v9 = vld [vmem:[%s1937_s3] sm:$0xff]  ;;  %vm604_vm1 = vcmask 244736   ;;  %vm1264_vm2 = vcmask 15360  }
   0xd   : > { %s1692_s15 = scalar_lea.vmem %s1934_s0, %s1343_s12  ;;  %1465 = vmatprep.subr.msk.mxu0 %vm653_vm0, %v596_v4  ;;  %1561 = vmatprep.subr.msk.mxu1 %vm653_vm0, %v596_v4  ;;  %v1729_v24 = vld [vmem:[%s1935_s1] ss:$0 sm:$0xff]  ;;  %v1734_v25 = vld [vmem:[%s1935_s1 + $0x1] ss:$0 sm:$0xff]  ;;  %s1885_s18 = scalar_lea.vmem %s1943_s9, %s1343_s12 }
   0xe   : > { %v337_v1 = vld [vmem:[%s1692_s15 + $0x8] sm:$0xff]  ;;  %v336_v2 = vld [vmem:[%s1692_s15] sm:$0xff]  ;;  %v338_v6 = vld [vmem:[%s1692_s15 + $0x10] sm:$0xff]  ;;  %1466 = vmatpush3.msk.msra.mxu0 %vm653_vm0, %v596_v4  ;;  %1565 = vmatpush3.msk.msra.mxu1 %vm653_vm0, %v596_v4 }
   0xf   : > { %360 = vperm.xlu1 %1581, %v337_v1   ;;  %355 = vperm.xlu0 %1579, %v336_v2   ;;  %v339_v8 = vld [vmem:[%s1692_s15 + $0x18] sm:$0xff]  ;;  %v340_v10 = vld [vmem:[%s1692_s15 + $0x20] sm:$0xff]  ;;  %v341_v11 = vld [vmem:[%s1692_s15 + $0x28] sm:$0xff] }
  0x10   : > { %1467 = vmatprep.subr.mxu0 %v595_v5  ;;  %1562 = vmatprep.subr.mxu1 %v595_v5  ;;  %v342_v12 = vld [vmem:[%s1692_s15 + $0x30] sm:$0xff]  ;;  %v343_v13 = vld [vmem:[%s1692_s15 + $0x38] sm:$0xff]  ;;  %v344_v14 = vld [vmem:[%s1692_s15 + $0x40] sm:$0xff] }
  0x11   : > { %1468 = vmatpush3.msra.mxu0 %v595_v5  ;;  %1566 = vmatpush3.msra.mxu1 %v595_v5  ;;  %v345_v15 = vld [vmem:[%s1692_s15 + $0x48] sm:$0xff]  ;;  %v346_v16 = vld [vmem:[%s1692_s15 + $0x50] sm:$0xff]  ;;  %v347_v17 = vld [vmem:[%s1692_s15 + $0x58] sm:$0xff] }
  0x12   : > { %1469 = vmatprep.subr.mxu0 %v594_v7  ;;  %1563 = vmatprep.subr.mxu1 %v594_v7  ;;  %v348_v18 = vld [vmem:[%s1692_s15 + $0x60] sm:$0xff]  ;;  %v349_v19 = vld [vmem:[%s1692_s15 + $0x68] sm:$0xff]  ;;  %v350_v20 = vld [vmem:[%s1692_s15 + $0x70] sm:$0xff] }
  0x13   : > { %1582 = vset.pattern.permute.xlu1 %v1625_v3  ;;  %1580 = vset.pattern.permute.xlu0 %v1625_v3  ;;  %v351_v21 = vld [vmem:[%s1692_s15 + $0x78] sm:$0xff]  ;;  %v1743_v32 = vld [vmem:[%s1936_s2] ss:$0 sm:$0xff] }
  0x14   : > { %459 = vperm.xlu1 %1582, %v337_v1   ;;  %455 = vperm.xlu0 %1580, %v336_v2  }
  0x15   : > { %1470 = vmatpush3.msra.mxu0 %v594_v7  ;;  %1567 = vmatpush3.msra.mxu1 %v594_v7 }
  0x16   : > { %1471 = vmatprep.subr.mxu0 %v593_v9  ;;  %1564 = vmatprep.subr.mxu1 %v593_v9 }
  0x17   : > { %1472 = vmatpush3.msra.mxu0 %v593_v9  ;;  %1568 = vmatpush3.msra.mxu1 %v593_v9 }
  0x18   : > { %1583 = vset.pattern.permute.xlu1 %v1624_v0  ;;  %463 = vperm.xlu0 %1580, %v338_v6  }
  0x19   : > { %365 = vperm.xlu1 %1583, %v338_v6  }
  0x1c   : > { %467 = vperm.xlu0 %1580, %v339_v8  }
  0x1d   : > { %370 = vperm.xlu1 %1583, %v339_v8  }
  0x20   : > { %471 = vperm.xlu0 %1580, %v340_v10  }
  0x21   : > { %375 = vperm.xlu1 %1583, %v340_v10  }
  0x24   : > { %475 = vperm.xlu0 %1580, %v341_v11  }
  0x25   : > { %380 = vperm.xlu1 %1583, %v341_v11  }
  0x28   : > { %479 = vperm.xlu0 %1580, %v342_v12  }
  0x29   : > { %385 = vperm.xlu1 %1583, %v342_v12  }
  0x2c   : > { %483 = vperm.xlu0 %1580, %v343_v13  }
  0x2d   : > { %390 = vperm.xlu1 %1583, %v343_v13  }
  0x30   : > { %487 = vperm.xlu0 %1580, %v344_v14  }
  0x31   : > { %395 = vperm.xlu1 %1583, %v344_v14  }
  0x34   : > { %491 = vperm.xlu0 %1580, %v345_v15  }
  0x35   : > { %400 = vperm.xlu1 %1583, %v345_v15  }
  0x38   : > { %495 = vperm.xlu0 %1580, %v346_v16  }
  0x39   : > { %405 = vperm.xlu1 %1583, %v346_v16  }
  0x3c   : > { %499 = vperm.xlu0 %1580, %v347_v17  }
  0x3d   : > { %410 = vperm.xlu1 %1583, %v347_v17  }
  0x40   : > { %503 = vperm.xlu0 %1580, %v348_v18  }
  0x41   : > { %415 = vperm.xlu1 %1583, %v348_v18  }
  0x44   : > { %507 = vperm.xlu0 %1580, %v349_v19  }
  0x45   : > { %420 = vperm.xlu1 %1583, %v349_v19  }
  0x48   : > { %511 = vperm.xlu0 %1580, %v350_v20  }
  0x49   : > { %425 = vperm.xlu1 %1583, %v350_v20  }
  0x4c   : > { %515 = vperm.xlu0 %1580, %v351_v21  }
  0x4d   : > { %430 = vperm.xlu1 %1583, %v351_v21  }
  0x8a   : > { %v361_v22 = vpop.permute.xlu1 %360  ;;  %v356_v23 = vpop.permute.xlu0 %355 }
  0x8b   : > { %v438_v28 = vmul.f32 %v1729_v24, %v361_v22  ;;  %v437_v29 = vmul.f32 %v1729_v24, %v356_v23 }
  0x8f   : > { %v460_v26 = vpop.permute.xlu1 %459  ;;  %v456_v27 = vpop.permute.xlu0 %455 }
  0x90   : > { %v523_v30 = vmul.f32 %v1734_v25, %v460_v26  ;;  %v522_v31 = vmul.f32 %v1734_v25, %v456_v27 }
  0x92   : > { %v539_v33 = vadd.f32 %v523_v30, %v438_v28  ;;  %v538_v34 = vadd.f32 %v522_v31, %v437_v29 }
  0x93   : > { %v464_v35 = vpop.permute.xlu0 %463 }
  0x94   : > { %v562_v36 = vadd.f32 %v1743_v32, %v539_v33  ;;  %v524_v37 = vmul.f32 %v1734_v25, %v464_v35  ;;  %v366_v38 = vpop.permute.xlu1 %365  ;;  %v561_v39 = vadd.f32 %v1743_v32, %v538_v34 }
  0x95   : > { %v439_v40 = vmul.f32 %v1729_v24, %v366_v38 }
  0x96   : > { %v578_v41 = vmax.f32 %v562_v36, 0.0  ;;  %v577_v42 = vmax.f32 %v561_v39, 0.0 }
  0x97   : > { %v540_v43 = vadd.f32 %v524_v37, %v439_v40  ;;  %v468_v44 = vpop.permute.xlu0 %467 }
  0x98   : > { %v525_v45 = vmul.f32 %v1734_v25, %v468_v44  ;;  %v371_v46 = vpop.permute.xlu1 %370  ;;  %1473 = vmatprep.mubr.msk.f32.mxu0 %vm604_vm1, %v577_v42 }
  0x99   : > { %v563_v47 = vadd.f32 %v1743_v32, %v540_v43  ;;  %v440_v48 = vmul.f32 %v1729_v24, %v371_v46  ;;  %1474 = vmatmul.mubr.msk.f32.vlgmr.msra.gmra.mxu0 %vm604_vm1, %v578_v41 }
  0x9b   : > { %v579_v49 = vmax.f32 %v563_v47, 0.0  ;;  %v541_v50 = vadd.f32 %v525_v45, %v440_v48  ;;  %v472_v51 = vpop.permute.xlu0 %471 }
  0x9c   : > { %v526_v52 = vmul.f32 %v1734_v25, %v472_v51  ;;  %v376_v53 = vpop.permute.xlu1 %375 }
  0x9d   : > { %v564_v54 = vadd.f32 %v1743_v32, %v541_v50  ;;  %v441_v55 = vmul.f32 %v1729_v24, %v376_v53  ;;  %1476 = vmatprep.mubr.msk.f32.mxu0 %vm604_vm1, %v579_v49 }
  0x9f   : > { %v580_v56 = vmax.f32 %v564_v54, 0.0  ;;  %v542_v57 = vadd.f32 %v526_v52, %v441_v55  ;;  %v476_v58 = vpop.permute.xlu0 %475 }
  0xa0   : > { %v527_v59 = vmul.f32 %v1734_v25, %v476_v58  ;;  %v381_v60 = vpop.permute.xlu1 %380 }
  0xa1   : > { %v565_v61 = vadd.f32 %v1743_v32, %v542_v57  ;;  %v442_v62 = vmul.f32 %v1729_v24, %v381_v60  ;;  %1477 = vmatmul.mubr.msk.f32.gmra.mxu0 %vm604_vm1, %v580_v56 }
  0xa3   : > { %v581_v63 = vmax.f32 %v565_v61, 0.0  ;;  %v543_v0 = vadd.f32 %v527_v59, %v442_v62  ;;  %v480_v1 = vpop.permute.xlu0 %479 }
  0xa4   : > { %v528_v2 = vmul.f32 %v1734_v25, %v480_v1  ;;  %v386_v3 = vpop.permute.xlu1 %385 }
  0xa5   : > { %v566_v4 = vadd.f32 %v1743_v32, %v543_v0  ;;  %v443_v5 = vmul.f32 %v1729_v24, %v386_v3  ;;  %1479 = vmatprep.mubr.msk.f32.mxu0 %vm604_vm1, %v581_v63 }
  0xa7   : > { %v582_v6 = vmax.f32 %v566_v4, 0.0  ;;  %v544_v7 = vadd.f32 %v528_v2, %v443_v5  ;;  %v484_v8 = vpop.permute.xlu0 %483 }
  0xa8   : > { %v529_v9 = vmul.f32 %v1734_v25, %v484_v8  ;;  %v391_v10 = vpop.permute.xlu1 %390 }
  0xa9   : > { %v567_v11 = vadd.f32 %v1743_v32, %v544_v7  ;;  %v444_v12 = vmul.f32 %v1729_v24, %v391_v10  ;;  %1480 = vmatmul.mubr.msk.f32.gmra.mxu0 %vm604_vm1, %v582_v6 }
  0xab   : > { %v583_v13 = vmax.f32 %v567_v11, 0.0  ;;  %v545_v14 = vadd.f32 %v529_v9, %v444_v12  ;;  %v488_v15 = vpop.permute.xlu0 %487  ;;  %v818_v12 = vld [vmem:[%s1939_s5] sm:$0xff] }
  0xac   : > { %v530_v16 = vmul.f32 %v1734_v25, %v488_v15  ;;  %v396_v17 = vpop.permute.xlu1 %395 }
  0xad   : > { %v568_v18 = vadd.f32 %v1743_v32, %v545_v14  ;;  %v445_v19 = vmul.f32 %v1729_v24, %v396_v17  ;;  %1482 = vmatprep.mubr.msk.f32.mxu0 %vm604_vm1, %v583_v13  ;;  %v1349_v13 = vld [vmem:[%s1938_s4] ss:$0 sm:$0xff] }
  0xaf   : > { %v584_v20 = vmax.f32 %v568_v18, 0.0  ;;  %v546_v21 = vadd.f32 %v530_v16, %v445_v19  ;;  %v492_v22 = vpop.permute.xlu0 %491 }
  0xb0   : > { %v531_v23 = vmul.f32 %v1734_v25, %v492_v22  ;;  %v401_v26 = vpop.permute.xlu1 %400 }
  0xb1   : > { %v446_v27 = vmul.f32 %v1729_v24, %v401_v26  ;;  %1483 = vmatmul.mubr.msk.f32.gmra.mxu0 %vm604_vm1, %v584_v20  ;;  %v569_v28 = vadd.f32 %v1743_v32, %v546_v21 }
  0xb3   : > { %v547_v29 = vadd.f32 %v531_v23, %v446_v27  ;;  %v496_v30 = vpop.permute.xlu0 %495  ;;  %v585_v31 = vmax.f32 %v569_v28, 0.0 }
  0xb4   : > { %v532_v33 = vmul.f32 %v1734_v25, %v496_v30  ;;  %v406_v34 = vpop.permute.xlu1 %405 }
  0xb5   : > { %v570_v35 = vadd.f32 %v1743_v32, %v547_v29  ;;  %v447_v36 = vmul.f32 %v1729_v24, %v406_v34  ;;  %1485 = vmatprep.mubr.msk.f32.mxu1 %vm604_vm1, %v585_v31 }
  0xb7   : > { %v586_v37 = vmax.f32 %v570_v35, 0.0  ;;  %v548_v38 = vadd.f32 %v532_v33, %v447_v36  ;;  %v500_v39 = vpop.permute.xlu0 %499 }
  0xb8   : > { %v533_v40 = vmul.f32 %v1734_v25, %v500_v39  ;;  %v411_v41 = vpop.permute.xlu1 %410 }
  0xb9   : > { %v571_v42 = vadd.f32 %v1743_v32, %v548_v38  ;;  %v448_v43 = vmul.f32 %v1729_v24, %v411_v41  ;;  %1486 = vmatmul.mubr.msk.f32.vlgmr.msra.gmra.mxu1 %vm604_vm1, %v586_v37 }
  0xbb   : > { %v587_v44 = vmax.f32 %v571_v42, 0.0  ;;  %v549_v45 = vadd.f32 %v533_v40, %v448_v43  ;;  %v504_v46 = vpop.permute.xlu0 %503 }
  0xbc   : > { %v534_v47 = vmul.f32 %v1734_v25, %v504_v46  ;;  %v416_v48 = vpop.permute.xlu1 %415 }
  0xbd   : > { %v572_v49 = vadd.f32 %v1743_v32, %v549_v45  ;;  %v449_v50 = vmul.f32 %v1729_v24, %v416_v48  ;;  %1488 = vmatprep.mubr.msk.f32.mxu1 %vm604_vm1, %v587_v44 }
  0xbf   : > { %v588_v51 = vmax.f32 %v572_v49, 0.0  ;;  %v550_v52 = vadd.f32 %v534_v47, %v449_v50  ;;  %v508_v53 = vpop.permute.xlu0 %507 }
  0xc0   : > { %v535_v54 = vmul.f32 %v1734_v25, %v508_v53  ;;  %v421_v55 = vpop.permute.xlu1 %420 }
  0xc1   : > { %v573_v56 = vadd.f32 %v1743_v32, %v550_v52  ;;  %v450_v57 = vmul.f32 %v1729_v24, %v421_v55  ;;  %1489 = vmatmul.mubr.msk.f32.gmra.mxu1 %vm604_vm1, %v588_v51 }
  0xc3   : > { %v589_v58 = vmax.f32 %v573_v56, 0.0  ;;  %v551_v59 = vadd.f32 %v535_v54, %v450_v57  ;;  %v512_v60 = vpop.permute.xlu0 %511 }
  0xc4   : > { %v536_v61 = vmul.f32 %v1734_v25, %v512_v60  ;;  %v426_v62 = vpop.permute.xlu1 %425 }
  0xc5   : > { %v574_v63 = vadd.f32 %v1743_v32, %v551_v59  ;;  %v451_v0 = vmul.f32 %v1729_v24, %v426_v62  ;;  %1491 = vmatprep.mubr.msk.f32.mxu1 %vm604_vm1, %v589_v58 }
  0xc7   : > { %v590_v1 = vmax.f32 %v574_v63, 0.0  ;;  %v552_v2 = vadd.f32 %v536_v61, %v451_v0  ;;  %v516_v3 = vpop.permute.xlu0 %515 }
  0xc8   : > { %v537_v4 = vmul.f32 %v1734_v25, %v516_v3  ;;  %v431_v5 = vpop.permute.xlu1 %430  ;;  %v821_v25 = vld [vmem:[%s1939_s5 + $0x18] sm:$0x3f]  ;;  %v1042_v3 = vld [vmem:[%s1941_s7 + $0x8] sm:$0xff] }
  0xc9   : > { %v575_v6 = vadd.f32 %v1743_v32, %v552_v2  ;;  %v452_v7 = vmul.f32 %v1729_v24, %v431_v5  ;;  %1492 = vmatmul.mubr.msk.f32.gmra.mxu1 %vm604_vm1, %v590_v1  ;;  %1497 = vmatprep.subr.msk.mxu1 %vm653_vm0, %v821_v25  ;;  %v820_v24 = vld [vmem:[%s1939_s5 + $0x10] sm:$0xff]  ;;  %v1044_v1 = vld [vmem:[%s1941_s7 + $0x18] sm:$0x3f]  ;;  %v1367_v5 = vld [vmem:[%s1940_s6] ss:$0 sm:$0xff] }
  0xca   : > { %1498 = vmatpush3.msk.msra.mxu1 %vm653_vm0, %v821_v25  ;;  %1529 = vmatprep.subr.msk.mxu0 %vm653_vm0, %v1044_v1  ;;  %v1043_v2 = vld [vmem:[%s1941_s7 + $0x10] sm:$0xff] }
  0xcb   : > { %v591_v8 = vmax.f32 %v575_v6, 0.0  ;;  %v553_v9 = vadd.f32 %v537_v4, %v452_v7  ;;  %1499 = vmatprep.subr.mxu1 %v820_v24  ;;  %1530 = vmatpush3.msk.msra.mxu0 %vm653_vm0, %v1044_v1  ;;  %v1041_v4 = vld [vmem:[%s1941_s7] sm:$0xff] }
  0xcc   : > { %1500 = vmatpush3.msra.mxu1 %v820_v24  ;;  %1531 = vmatprep.subr.mxu0 %v1043_v2 }
  0xcd   : > { %v576_v10 = vadd.f32 %v1743_v32, %v553_v9  ;;  %1494 = vmatprep.mubr.msk.f32.mxu1 %vm604_vm1, %v591_v8  ;;  %v819_v32 = vld [vmem:[%s1939_s5 + $0x8] sm:$0xff]  ;;  %1532 = vmatpush3.msra.mxu0 %v1043_v2 }
  0xce   : > { %1501 = vmatprep.subr.mxu1 %v819_v32  ;;  %1533 = vmatprep.subr.mxu0 %v1042_v3 }
  0xcf   : > { %v592_v11 = vmax.f32 %v576_v10, 0.0  ;;  %1502 = vmatpush3.msra.mxu1 %v819_v32  ;;  %1534 = vmatpush3.msra.mxu0 %v1042_v3 }
  0xd0   : > { %1503 = vmatprep.subr.mxu1 %v818_v12  ;;  %1535 = vmatprep.subr.mxu0 %v1041_v4 }
  0xd1   : > { %1495 = vmatmul.mubr.msk.f32.gmra.mxu1 %vm604_vm1, %v592_v11  ;;  %1536 = vmatpush3.msra.mxu0 %v1041_v4 }
  0xd2   : > { %1504 = vmatpush3.msra.mxu1 %v818_v12 }
 0x159   : > { %v1475_v14 = vpop.f32.mrf.mxu0 }
 0x15a   : > { %v729_v15 = vadd.f32 %v1475_v14, %v1349_v13 }
 0x15b   : > { %v723_v16 = vpop.f32.mrf.mxu0 }
 0x15c   : > { %v724_v17 = vadd.f32 %v1349_v13, %v723_v16  ;;  %v803_v19 = vmax.f32 %v729_v15, 0.0 }
 0x15e   : > { %v802_v18 = vmax.f32 %v724_v17, 0.0 }
 0x160   : > { %1505 = vmatprep.mubr.msk.f32.mxu1 %vm604_vm1, %v802_v18 }
 0x161   : > { %v1478_v20 = vpop.f32.mrf.mxu0  ;;  %1506 = vmatmul.mubr.msk.f32.vlgmr.msra.gmra.mxu1 %vm604_vm1, %v803_v19 }
 0x162   : > { %v739_v21 = vadd.f32 %v1478_v20, %v1349_v13 }
 0x163   : > { %v733_v22 = vpop.f32.mrf.mxu0 }
 0x164   : > { %v734_v23 = vadd.f32 %v1349_v13, %v733_v22  ;;  %v805_v27 = vmax.f32 %v739_v21, 0.0 }
 0x166   : > { %v804_v26 = vmax.f32 %v734_v23, 0.0 }
 0x168   : > { %1508 = vmatprep.mubr.msk.f32.mxu1 %vm604_vm1, %v804_v26 }
 0x169   : > { %v1481_v28 = vpop.f32.mrf.mxu0  ;;  %1509 = vmatmul.mubr.msk.f32.gmra.mxu1 %vm604_vm1, %v805_v27 }
 0x16a   : > { %v749_v29 = vadd.f32 %v1481_v28, %v1349_v13 }
 0x16b   : > { %v743_v30 = vpop.f32.mrf.mxu0 }
 0x16c   : > { %v744_v31 = vadd.f32 %v1349_v13, %v743_v30  ;;  %v807_v34 = vmax.f32 %v749_v29, 0.0 }
 0x16e   : > { %v806_v33 = vmax.f32 %v744_v31, 0.0 }
 0x170   : > { %1511 = vmatprep.mubr.msk.f32.mxu1 %vm604_vm1, %v806_v33 }
 0x171   : > { %v1484_v35 = vpop.f32.mrf.mxu0  ;;  %1512 = vmatmul.mubr.msk.f32.gmra.mxu1 %vm604_vm1, %v807_v34 }
 0x172   : > { %v759_v36 = vadd.f32 %v1484_v35, %v1349_v13 }
 0x173   : > { %v753_v37 = vpop.f32.mrf.mxu0 }
 0x174   : > { %v754_v38 = vadd.f32 %v1349_v13, %v753_v37  ;;  %v809_v40 = vmax.f32 %v759_v36, 0.0 }
 0x176   : > { %v808_v39 = vmax.f32 %v754_v38, 0.0 }
 0x178   : > { %1514 = vmatprep.mubr.msk.f32.mxu1 %vm604_vm1, %v808_v39 }
 0x179   : > { %v1487_v41 = vpop.f32.mrf.mxu1  ;;  %1515 = vmatmul.mubr.msk.f32.gmra.mxu1 %vm604_vm1, %v809_v40 }
 0x17a   : > { %v769_v42 = vadd.f32 %v1487_v41, %v1349_v13 }
 0x17b   : > { %v763_v43 = vpop.f32.mrf.mxu1 }
 0x17c   : > { %v764_v44 = vadd.f32 %v1349_v13, %v763_v43  ;;  %v811_v46 = vmax.f32 %v769_v42, 0.0 }
 0x17e   : > { %v810_v45 = vmax.f32 %v764_v44, 0.0 }
 0x180   : > { %1517 = vmatprep.mubr.msk.f32.mxu1 %vm604_vm1, %v810_v45 }
 0x181   : > { %v1490_v47 = vpop.f32.mrf.mxu1  ;;  %1518 = vmatmul.mubr.msk.f32.gmra.mxu1 %vm604_vm1, %v811_v46 }
 0x182   : > { %v779_v48 = vadd.f32 %v1490_v47, %v1349_v13 }
 0x183   : > { %v773_v49 = vpop.f32.mrf.mxu1 }
 0x184   : > { %v774_v50 = vadd.f32 %v1349_v13, %v773_v49  ;;  %v813_v52 = vmax.f32 %v779_v48, 0.0 }
 0x186   : > { %v812_v51 = vmax.f32 %v774_v50, 0.0 }
 0x188   : > { %1520 = vmatprep.mubr.msk.f32.mxu1 %vm604_vm1, %v812_v51 }
 0x189   : > { %v1493_v53 = vpop.f32.mrf.mxu1  ;;  %1521 = vmatmul.mubr.msk.f32.gmra.mxu1 %vm604_vm1, %v813_v52 }
 0x18a   : > { %v789_v54 = vadd.f32 %v1493_v53, %v1349_v13 }
 0x18b   : > { %v783_v55 = vpop.f32.mrf.mxu1 }
 0x18c   : > { %v784_v56 = vadd.f32 %v1349_v13, %v783_v55  ;;  %v815_v58 = vmax.f32 %v789_v54, 0.0  ;;  %v1874_v54 = vld [vmem:[%s1942_s8] ss:$0 sm:$0xff] }
 0x18e   : > { %v814_v57 = vmax.f32 %v784_v56, 0.0 }
 0x190   : > { %1523 = vmatprep.mubr.msk.f32.mxu1 %vm604_vm1, %v814_v57 }
 0x191   : > { %v1496_v59 = vpop.f32.mrf.mxu1  ;;  %1524 = vmatmul.mubr.msk.f32.gmra.mxu1 %vm604_vm1, %v815_v58 }
 0x192   : > { %v799_v60 = vadd.f32 %v1496_v59, %v1349_v13 }
 0x193   : > { %v793_v61 = vpop.f32.mrf.mxu1 }
 0x194   : > { %v794_v62 = vadd.f32 %v1349_v13, %v793_v61  ;;  %v817_v0 = vmax.f32 %v799_v60, 0.0 }
 0x196   : > { %v816_v63 = vmax.f32 %v794_v62, 0.0 }
 0x198   : > { %1526 = vmatprep.mubr.msk.f32.mxu1 %vm604_vm1, %v816_v63 }
 0x199   : > { %1527 = vmatmul.mubr.msk.f32.gmra.mxu1 %vm604_vm1, %v817_v0 }
 0x221   : > { %v1507_v6 = vpop.f32.mrf.mxu1 }
 0x222   : > { %v952_v7 = vadd.f32 %v1507_v6, %v1367_v5 }
 0x223   : > { %v946_v8 = vpop.f32.mrf.mxu1 }
 0x224   : > { %v947_v9 = vadd.f32 %v1367_v5, %v946_v8  ;;  %v1026_v11 = vmax.f32 %v952_v7, 0.0 }
 0x226   : > { %v1025_v10 = vmax.f32 %v947_v9, 0.0 }
 0x228   : > { %1537 = vmatprep.mubr.msk.f32.mxu0 %vm604_vm1, %v1025_v10 }
 0x229   : > { %v1510_v25 = vpop.f32.mrf.mxu1  ;;  %1538 = vmatmul.mubr.msk.f32.vlgmr.msra.gmra.mxu0 %vm604_vm1, %v1026_v11 }
 0x22a   : > { %v962_v24 = vadd.f32 %v1510_v25, %v1367_v5 }
 0x22b   : > { %v956_v32 = vpop.f32.mrf.mxu1 }
 0x22c   : > { %v957_v12 = vadd.f32 %v1367_v5, %v956_v32  ;;  %v1028_v14 = vmax.f32 %v962_v24, 0.0 }
 0x22e   : > { %v1027_v13 = vmax.f32 %v957_v12, 0.0 }
 0x230   : > { %1540 = vmatprep.mubr.msk.f32.mxu0 %vm604_vm1, %v1027_v13 }
 0x231   : > { %v1513_v15 = vpop.f32.mrf.mxu1  ;;  %1541 = vmatmul.mubr.msk.f32.gmra.mxu0 %vm604_vm1, %v1028_v14 }
 0x232   : > { %v972_v16 = vadd.f32 %v1513_v15, %v1367_v5 }
 0x233   : > { %v966_v17 = vpop.f32.mrf.mxu1 }
 0x234   : > { %v967_v18 = vadd.f32 %v1367_v5, %v966_v17  ;;  %v1030_v20 = vmax.f32 %v972_v16, 0.0 }
 0x236   : > { %v1029_v19 = vmax.f32 %v967_v18, 0.0 }
 0x238   : > { %1543 = vmatprep.mubr.msk.f32.mxu0 %vm604_vm1, %v1029_v19 }
 0x239   : > { %v1516_v21 = vpop.f32.mrf.mxu1  ;;  %1544 = vmatmul.mubr.msk.f32.gmra.mxu0 %vm604_vm1, %v1030_v20 }
 0x23a   : > { %v982_v22 = vadd.f32 %v1516_v21, %v1367_v5 }
 0x23b   : > { %v976_v23 = vpop.f32.mrf.mxu1 }
 0x23c   : > { %v977_v26 = vadd.f32 %v1367_v5, %v976_v23  ;;  %v1032_v28 = vmax.f32 %v982_v22, 0.0 }
 0x23e   : > { %v1031_v27 = vmax.f32 %v977_v26, 0.0 }
 0x240   : > { %1546 = vmatprep.mubr.msk.f32.mxu0 %vm604_vm1, %v1031_v27 }
 0x241   : > { %v1519_v29 = vpop.f32.mrf.mxu1  ;;  %1547 = vmatmul.mubr.msk.f32.gmra.mxu0 %vm604_vm1, %v1032_v28 }
 0x242   : > { %v992_v30 = vadd.f32 %v1519_v29, %v1367_v5 }
 0x243   : > { %v986_v31 = vpop.f32.mrf.mxu1 }
 0x244   : > { %v987_v33 = vadd.f32 %v1367_v5, %v986_v31  ;;  %v1034_v35 = vmax.f32 %v992_v30, 0.0 }
 0x246   : > { %v1033_v34 = vmax.f32 %v987_v33, 0.0 }
 0x248   : > { %1549 = vmatprep.mubr.msk.f32.mxu0 %vm604_vm1, %v1033_v34 }
 0x249   : > { %v1522_v36 = vpop.f32.mrf.mxu1  ;;  %1550 = vmatmul.mubr.msk.f32.gmra.mxu0 %vm604_vm1, %v1034_v35 }
 0x24a   : > { %v1002_v37 = vadd.f32 %v1522_v36, %v1367_v5 }
 0x24b   : > { %v996_v38 = vpop.f32.mrf.mxu1 }
 0x24c   : > { %v997_v39 = vadd.f32 %v1367_v5, %v996_v38  ;;  %v1036_v41 = vmax.f32 %v1002_v37, 0.0 }
 0x24e   : > { %v1035_v40 = vmax.f32 %v997_v39, 0.0 }
 0x250   : > { %1552 = vmatprep.mubr.msk.f32.mxu0 %vm604_vm1, %v1035_v40 }
 0x251   : > { %v1525_v42 = vpop.f32.mrf.mxu1  ;;  %1553 = vmatmul.mubr.msk.f32.gmra.mxu0 %vm604_vm1, %v1036_v41 }
 0x252   : > { %v1012_v43 = vadd.f32 %v1525_v42, %v1367_v5 }
 0x253   : > { %v1006_v44 = vpop.f32.mrf.mxu1 }
 0x254   : > { %v1007_v45 = vadd.f32 %v1367_v5, %v1006_v44  ;;  %v1038_v47 = vmax.f32 %v1012_v43, 0.0 }
 0x256   : > { %v1037_v46 = vmax.f32 %v1007_v45, 0.0 }
 0x258   : > { %1555 = vmatprep.mubr.msk.f32.mxu0 %vm604_vm1, %v1037_v46 }
 0x259   : > { %v1528_v48 = vpop.f32.mrf.mxu1  ;;  %1556 = vmatmul.mubr.msk.f32.gmra.mxu0 %vm604_vm1, %v1038_v47 }
 0x25a   : > { %v1022_v49 = vadd.f32 %v1528_v48, %v1367_v5 }
 0x25b   : > { %v1016_v50 = vpop.f32.mrf.mxu1 }
 0x25c   : > { %v1017_v51 = vadd.f32 %v1367_v5, %v1016_v50  ;;  %v1040_v53 = vmax.f32 %v1022_v49, 0.0 }
 0x25e   : > { %v1039_v52 = vmax.f32 %v1017_v51, 0.0 }
 0x260   : > { %1558 = vmatprep.mubr.msk.f32.mxu0 %vm604_vm1, %v1039_v52 }
 0x261   : > { %1559 = vmatmul.mubr.msk.f32.gmra.mxu0 %vm604_vm1, %v1040_v53 }
 0x2e9   : > { %v1539_v55 = vpop.f32.mrf.mxu0 }
 0x2ea   : > { %v1175_v56 = vadd.f32 %v1539_v55, %v1874_v54 }
 0x2eb   : > { %v1169_v57 = vpop.f32.mrf.mxu0 }
 0x2ec   : > { %1584 = vtanh.f32 %v1175_v56  ;;  %v1170_v58 = vadd.f32 %v1874_v54, %v1169_v57 }
 0x2ee   : > { %1586 = vtanh.f32 %v1170_v58 }
 0x2f1   : > { %v1542_v59 = vpop.f32.mrf.mxu0 }
 0x2f2   : > { %v1185_v60 = vadd.f32 %v1542_v59, %v1874_v54 }
 0x2f3   : > { %v1179_v61 = vpop.f32.mrf.mxu0 }
 0x2f4   : > { %1588 = vtanh.f32 %v1185_v60  ;;  %v1180_v62 = vadd.f32 %v1874_v54, %v1179_v61 }
 0x2f6   : > { %1590 = vtanh.f32 %v1180_v62 }
 0x2f9   : > { %v1585_v63 = vpop.eup %1584  ;;  %v1545_v0 = vpop.f32.mrf.mxu0 }
 0x2fa   : > { %1266 = vst.msk [vmem:[%s1885_s18 + $0x8] sm:$0xff] %vm1264_vm2, %v1585_v63  ;;  %v1195_v1 = vadd.f32 %v1545_v0, %v1874_v54 }
 0x2fb   : > { %v1587_v2 = vpop.eup %1586  ;;  %v1189_v3 = vpop.f32.mrf.mxu0 }
 0x2fc   : > { %1265 = vst.msk [vmem:[%s1885_s18] sm:$0xff] %vm1264_vm2, %v1587_v2  ;;  %1592 = vtanh.f32 %v1195_v1  ;;  %v1190_v4 = vadd.f32 %v1874_v54, %v1189_v3 }
 0x2fe   : > { %1594 = vtanh.f32 %v1190_v4 }
 0x301   : > { %v1589_v5 = vpop.eup %1588  ;;  %v1548_v6 = vpop.f32.mrf.mxu0 }
 0x302   : > { %1268 = vst.msk [vmem:[%s1885_s18 + $0x18] sm:$0xff] %vm1264_vm2, %v1589_v5  ;;  %v1205_v7 = vadd.f32 %v1548_v6, %v1874_v54 }
 0x303   : > { %v1591_v8 = vpop.eup %1590  ;;  %v1199_v9 = vpop.f32.mrf.mxu0 }
 0x304   : > { %1267 = vst.msk [vmem:[%s1885_s18 + $0x10] sm:$0xff] %vm1264_vm2, %v1591_v8  ;;  %1596 = vtanh.f32 %v1205_v7  ;;  %v1200_v10 = vadd.f32 %v1874_v54, %v1199_v9 }
 0x306   : > { %1598 = vtanh.f32 %v1200_v10 }
 0x309   : > { %v1593_v11 = vpop.eup %1592  ;;  %v1551_v25 = vpop.f32.mrf.mxu0 }
 0x30a   : > { %1270 = vst.msk [vmem:[%s1885_s18 + $0x28] sm:$0xff] %vm1264_vm2, %v1593_v11  ;;  %v1215_v24 = vadd.f32 %v1551_v25, %v1874_v54 }
 0x30b   : > { %v1595_v32 = vpop.eup %1594  ;;  %v1209_v12 = vpop.f32.mrf.mxu0 }
 0x30c   : > { %1269 = vst.msk [vmem:[%s1885_s18 + $0x20] sm:$0xff] %vm1264_vm2, %v1595_v32  ;;  %1600 = vtanh.f32 %v1215_v24  ;;  %v1210_v13 = vadd.f32 %v1874_v54, %v1209_v12 }
 0x30e   : > { %1602 = vtanh.f32 %v1210_v13 }
 0x311   : > { %v1597_v14 = vpop.eup %1596  ;;  %v1554_v15 = vpop.f32.mrf.mxu0 }
 0x312   : > { %1272 = vst.msk [vmem:[%s1885_s18 + $0x38] sm:$0xff] %vm1264_vm2, %v1597_v14  ;;  %v1225_v16 = vadd.f32 %v1554_v15, %v1874_v54 }
 0x313   : > { %v1599_v17 = vpop.eup %1598  ;;  %v1219_v18 = vpop.f32.mrf.mxu0 }
 0x314   : > { %1271 = vst.msk [vmem:[%s1885_s18 + $0x30] sm:$0xff] %vm1264_vm2, %v1599_v17  ;;  %1604 = vtanh.f32 %v1225_v16  ;;  %v1220_v19 = vadd.f32 %v1874_v54, %v1219_v18 }
 0x316   : > { %1606 = vtanh.f32 %v1220_v19 }
 0x319   : > { %v1601_v20 = vpop.eup %1600  ;;  %v1557_v21 = vpop.f32.mrf.mxu0 }
 0x31a   : > { %1274 = vst.msk [vmem:[%s1885_s18 + $0x48] sm:$0xff] %vm1264_vm2, %v1601_v20  ;;  %v1235_v22 = vadd.f32 %v1557_v21, %v1874_v54 }
 0x31b   : > { %v1603_v23 = vpop.eup %1602  ;;  %v1229_v26 = vpop.f32.mrf.mxu0 }
 0x31c   : > { %1273 = vst.msk [vmem:[%s1885_s18 + $0x40] sm:$0xff] %vm1264_vm2, %v1603_v23  ;;  %1608 = vtanh.f32 %v1235_v22  ;;  %v1230_v27 = vadd.f32 %v1874_v54, %v1229_v26 }
 0x31e   : > { %1610 = vtanh.f32 %v1230_v27 }
 0x321   : > { %v1605_v28 = vpop.eup %1604  ;;  %v1560_v29 = vpop.f32.mrf.mxu0 }
 0x322   : > { %1276 = vst.msk [vmem:[%s1885_s18 + $0x58] sm:$0xff] %vm1264_vm2, %v1605_v28  ;;  %v1245_v30 = vadd.f32 %v1560_v29, %v1874_v54 }
 0x323   : > { %v1607_v31 = vpop.eup %1606  ;;  %v1239_v33 = vpop.f32.mrf.mxu0 }
 0x324   : > { %1275 = vst.msk [vmem:[%s1885_s18 + $0x50] sm:$0xff] %vm1264_vm2, %v1607_v31  ;;  %1612 = vtanh.f32 %v1245_v30  ;;  %v1240_v34 = vadd.f32 %v1874_v54, %v1239_v33 }
 0x326   : > { %1614 = vtanh.f32 %v1240_v34 }
 0x329   : > { %v1609_v35 = vpop.eup %1608 }
 0x32a   : > { %1278 = vst.msk [vmem:[%s1885_s18 + $0x68] sm:$0xff] %vm1264_vm2, %v1609_v35 }
 0x32b   : > { %v1611_v36 = vpop.eup %1610 }
 0x32c   : > { %1277 = vst.msk [vmem:[%s1885_s18 + $0x60] sm:$0xff] %vm1264_vm2, %v1611_v36 }
 0x331   : > { %v1613_v37 = vpop.eup %1612 }
 0x332   : > { %1280 = vst.msk [vmem:[%s1885_s18 + $0x78] sm:$0xff] %vm1264_vm2, %v1613_v37 }
 0x333   : > { %v1615_v38 = vpop.eup %1614 }
 0x334   : > { %1279 = vst.msk [vmem:[%s1885_s18 + $0x70] sm:$0xff] %vm1264_vm2, %v1615_v38 }
 0x335 PF: > { %s19_s30 = sadd.s32 1, %s1622_s30  }
 0x336   : > { %p16_p4 = scmp.ge.s32.totalorder %s19_s30, 4  }
 0x338   :  { %18 = sbr.rel (!%p16_p4) target bundleno = 1 (0x1), region = 86 }

</bundles_post_ra>
